<compile_context>
chip_gen: v7x
topology: tpu7x:2x2x1
jax: 0.10.0
libtpu: 0.0.40
codegen_flags: <defaults>
</compile_context>

<pallas_src>
import jax
import jax.numpy as jnp
from jax import lax
from jax.experimental import pallas as pl
from jax.experimental.pallas import tpu as pltpu

BN_EPS = 1e-5


def _round_up(n, m):
    return ((n + m - 1) // m) * m


def _pick_batch_tile(B, L, T, itemsize, block_b):
    """Sublane-aligned batch tile that fits a conservative VMEM budget."""
    TB = _round_up(min(block_b, _round_up(B, 8)), 8)
    resident = (L * T + T) * 4                      # weight + bias (resident)
    budget = 12 * 1024 * 1024                       # under v5e's 16 MiB scoped default
    while TB > 8 and 2 * TB * (L + T) * itemsize + resident > budget:
        TB = max(8, _round_up(TB // 2, 8))
    return TB


def _latent_classifier_kernel(x_ref, w_ref, b_ref, o_ref):
    # x_ref: (TB, L)  input tile (BN already folded into w/b), dtype = x.dtype
    # w_ref: (L, T)   effective weight (transposed, BN-folded), dtype = x.dtype
    # b_ref: (1, T)   effective bias, float32
    # o_ref: (TB, T)  log-probabilities, dtype = x.dtype
    logits = jnp.dot(x_ref[...], w_ref[...],
                     preferred_element_type=jnp.float32)
    logits = logits + b_ref[...]

    # log_softmax along the target axis, f32 in-register.
    m = jnp.max(logits, axis=1, keepdims=True)
    shifted = logits - m
    lse = jnp.log(jnp.sum(jnp.exp(shifted), axis=1, keepdims=True))
    o_ref[...] = (shifted - lse).astype(o_ref.dtype)


def latent_classifier_forward(x, running_mean, running_var, weight, bias,
                              *, block_b=1024, min_pallas_elems=65536,
                              force_pallas=False):
    """x: (B, L); weight: (T, L); bias: (T,).  Returns (B, T) log-probs in x.dtype."""
    B, L = x.shape
    T = weight.shape[0]

    # --- Fold eval-mode BatchNorm (affine=False) into the linear layer (f32). ---
    w32 = weight.astype(jnp.float32)
    inv_std = lax.rsqrt(running_var.astype(jnp.float32) + BN_EPS)      # (L,)
    w_eff = (w32 * inv_std[None, :]).T.astype(x.dtype)                 # (L, T)
    b_eff = (bias.astype(jnp.float32)
             - (running_mean.astype(jnp.float32) * inv_std) @ w32.T)   # (T,)
    b_eff = b_eff.reshape(1, T)

    # --- Small-problem fallback: one grid step would be pure fixed cost. ---
    if not force_pallas and B * L < min_pallas_elems:
        logits = jnp.dot(x, w_eff, preferred_element_type=jnp.float32) + b_eff
        return jax.nn.log_softmax(logits, axis=1).astype(x.dtype)

    itemsize = jnp.dtype(x.dtype).itemsize
    TB = _pick_batch_tile(B, L, T, itemsize, block_b)
    grid = (pl.cdiv(B, TB),)   # ragged last block handled by Pallas clipping

    out = pl.pallas_call(
        _latent_classifier_kernel,
        out_shape=jax.ShapeDtypeStruct((B, T), x.dtype),
        grid=grid,
        in_specs=[
            pl.BlockSpec((TB, L), lambda i: (i, 0)),   # batch-tiled input
            pl.BlockSpec((L, T), lambda i: (0, 0)),    # resident weight
            pl.BlockSpec((1, T), lambda i: (0, 0)),    # resident bias
        ],
        out_specs=pl.BlockSpec((TB, T), lambda i: (i, 0)),
        compiler_params=pltpu.CompilerParams(
            dimension_semantics=("parallel",),         # megacore sharding
        ),
        cost_estimate=pl.CostEstimate(
            flops=2 * B * L * T,
            transcendentals=B * T,
            bytes_accessed=(B * L * itemsize + L * T * itemsize
                            + T * 4 + B * T * itemsize),
        ),
    )(x, w_eff, b_eff)

    return out


def _reference_forward(x, running_mean, running_var, weight, bias):
    x32 = x.astype(jnp.float32)
    x_hat = (x32 - running_mean) / jnp.sqrt(running_var + BN_EPS)
    logits = x_hat @ weight.astype(jnp.float32).T + bias
    return jax.nn.log_softmax(logits, axis=1)


def _make_params(key, latent_size, target_size):
    kw, kb, km, kv = jax.random.split(key, 4)
    bound = 1.0 / (latent_size ** 0.5)
    weight = jax.random.uniform(kw, (target_size, latent_size),
                                minval=-bound, maxval=bound, dtype=jnp.float32)
    bias = jax.random.uniform(kb, (target_size,),
                              minval=-bound, maxval=bound, dtype=jnp.float32)
    running_mean = 0.1 * jax.random.normal(km, (latent_size,), dtype=jnp.float32)
    running_var = 1.0 + 0.1 * jax.random.uniform(kv, (latent_size,),
                                                 dtype=jnp.float32)
    return weight, bias, running_mean, running_var


if __name__ == "__main__":
    key = jax.random.PRNGKey(0)
    k1, k2, k3, k4 = jax.random.split(key, 4)

    # --- Test 1: tiny shape, XLA fallback path + forced-Pallas path. ---
    B1, L1, T1 = 8, 32, 16
    w1, b1, m1, v1 = _make_params(k1, L1, T1)
    x1 = jax.random.normal(k2, (B1, L1), dtype=jnp.float32)
    ref1 = _reference_forward(x1, m1, v1, w1, b1)

    out1a = jax.block_until_ready(
        latent_classifier_forward(x1, m1, v1, w1, b1))               # fallback
    out1b = jax.block_until_ready(
        latent_classifier_forward(x1, m1, v1, w1, b1, force_pallas=True))
    assert out1a.shape == (B1, T1) and out1b.shape == (B1, T1)
    assert jnp.allclose(out1a, ref1, atol=1e-4, rtol=1e-4)
    assert jnp.allclose(out1b, ref1, atol=1e-4, rtol=1e-4)

    # --- Test 2: multi-step grid with ragged last block, f32 Pallas path. ---
    B2, L2, T2 = 2560, 128, 23
    w2, b2, m2, v2 = _make_params(k3, L2, T2)
    x2 = jax.random.normal(k4, (B2, L2), dtype=jnp.float32)
    out2 = jax.block_until_ready(
        latent_classifier_forward(x2, m2, v2, w2, b2))
    ref2 = _reference_forward(x2, m2, v2, w2, b2)
    assert out2.shape == (B2, T2)
    # BN-folding reassociates the FP math; allow a slightly looser tolerance.
    assert jnp.allclose(out2, ref2, atol=1e-4, rtol=1e-4)

    # --- Test 3: bf16 activations through the Pallas path. ---
    x2_bf16 = x2.astype(jnp.bfloat16)
    out3 = jax.block_until_ready(
        latent_classifier_forward(x2_bf16, m2, v2, w2, b2))
    assert out3.shape == (B2, T2) and out3.dtype == jnp.bfloat16
    assert jnp.allclose(out3.astype(jnp.float32), ref2, atol=1e-1, rtol=1e-1)

    print("KERNEL_OK")
</pallas_src>

<mosaic_0001>
module attributes {stable_mosaic.version = 11 : i64} {
  func.func @_latent_classifier_kernel(%arg0: i32, %arg1: memref<8x32xf32, #tpu.memory_space<vmem>>, %arg2: memref<32x16xf32, #tpu.memory_space<vmem>>, %arg3: memref<1x16xf32, #tpu.memory_space<vmem>>, %arg4: memref<8x16xf32, #tpu.memory_space<vmem>>) attributes {dimension_semantics = [#tpu.dimension_semantics<parallel>], iteration_bounds = array<i64: 1>, scalar_prefetch = 0 : i64, scratch_operands = 0 : i64, tpu.core_type = #tpu.core_type<tc>, window_params = [{transform_indices = @transform_0, window_bounds = array<i64: 8, 32>}, {pipeline_mode = #tpu.pipeline_mode<synchronous>, transform_indices = @transform_1, window_bounds = array<i64: 32, 16>}, {pipeline_mode = #tpu.pipeline_mode<synchronous>, transform_indices = @transform_2, window_bounds = array<i64: 1, 16>}, {transform_indices = @transform_3, window_bounds = array<i64: 8, 16>}]} {
    %c0 = arith.constant 0 : index
    %c0_0 = arith.constant 0 : index
    %0 = vector.load %arg1[%c0, %c0_0] : memref<8x32xf32, #tpu.memory_space<vmem>>, vector<8x32xf32>
    %c0_1 = arith.constant 0 : index
    %c0_2 = arith.constant 0 : index
    %1 = vector.load %arg2[%c0_1, %c0_2] : memref<32x16xf32, #tpu.memory_space<vmem>>, vector<32x16xf32>
    %cst = arith.constant dense<0.000000e+00> : vector<8x16xf32>
    %2 = tpu.matmul %0, %1, %cst {dimension_numbers = #tpu.dot_dimension_numbers<[1], [0], [0], [1], [0, 0, 1, 1], [], []>} : vector<8x32xf32>, vector<32x16xf32>, vector<8x16xf32> -> vector<8x16xf32>
    %c0_3 = arith.constant 0 : index
    %c0_4 = arith.constant 0 : index
    %3 = vector.load %arg3[%c0_3, %c0_4] : memref<1x16xf32, #tpu.memory_space<vmem>>, vector<1x16xf32>
    %4 = vector.broadcast %3 : vector<1x16xf32> to vector<8x16xf32>
    %5 = arith.addf %2, %4 : vector<8x16xf32>
    %cst_5 = arith.constant dense<0xFF800000> : vector<8xf32>
    %6 = vector.multi_reduction <maximumf>, %5, %cst_5 [1] : vector<8x16xf32> to vector<8xf32>
    %7 = vector.shape_cast %6 : vector<8xf32> to vector<8x1xf32>
    %8 = vector.broadcast %7 : vector<8x1xf32> to vector<8x16xf32>
    %9 = arith.subf %5, %8 : vector<8x16xf32>
    %10 = math.exp %9 : vector<8x16xf32>
    %cst_6 = arith.constant dense<0.000000e+00> : vector<8xf32>
    %11 = vector.multi_reduction <add>, %10, %cst_6 [1] : vector<8x16xf32> to vector<8xf32>
    %12 = vector.shape_cast %11 : vector<8xf32> to vector<8x1xf32>
    %13 = math.log %12 : vector<8x1xf32>
    %14 = vector.broadcast %13 : vector<8x1xf32> to vector<8x16xf32>
    %15 = arith.subf %9, %14 : vector<8x16xf32>
    %c0_7 = arith.constant 0 : index
    %c0_8 = arith.constant 0 : index
    %16 = vector.load %arg4[%c0_7, %c0_8] : memref<8x16xf32, #tpu.memory_space<vmem>>, vector<8x16xf32>
    tpu.vector_store %arg4[%c0_7, %c0_8], %15 {strides = array<i32>} : memref<8x16xf32, #tpu.memory_space<vmem>>, vector<8x16xf32>,
    return
  }
  func.func @transform_0(%arg0: i32) -> (i32, i32) {
    %c0_i32 = arith.constant 0 : i32
    %c0_i32_0 = arith.constant 0 : i32
    return %arg0, %c0_i32 : i32, i32
  }
  func.func @transform_1(%arg0: i32) -> (i32, i32) {
    %c0_i32 = arith.constant 0 : i32
    %c0_i32_0 = arith.constant 0 : i32
    %c0_i32_1 = arith.constant 0 : i32
    return %c0_i32, %c0_i32_0 : i32, i32
  }
  func.func @transform_2(%arg0: i32) -> (i32, i32) {
    %c0_i32 = arith.constant 0 : i32
    %c0_i32_0 = arith.constant 0 : i32
    %c0_i32_1 = arith.constant 0 : i32
    return %c0_i32, %c0_i32_0 : i32, i32
  }
  func.func @transform_3(%arg0: i32) -> (i32, i32) {
    %c0_i32 = arith.constant 0 : i32
    %c0_i32_0 = arith.constant 0 : i32
    return %arg0, %c0_i32 : i32, i32
  }
}

</mosaic_0001>

<bundles_post_ra>
// kernel: tpu_custom_call.1
= control target key start
LH: loop header
LB: loop body
LE: loop exit
PB: predicated region body
PF: predicated region fallthrough
CT: control target
= control target key end

     0   :  { %v185_v3 = vmov 0.0|0.0   ;;  %vm186_vm0 = vmmov 0   ;;  %v187_v6 = vmov 0.0   ;;  %s242_s0 = inlined_call_operand.vmem [shape: f32[8,32], index: 0, kind: input, shape index: {}]   ;;  %s243_s1 = inlined_call_operand.vmem [shape: f32[32,16], index: 1, kind: input, shape index: {}]   ;;  %s244_s2 = inlined_call_operand.vmem [shape: f32[1,16], index: 2, kind: input, shape index: {}]   ;;  %s245_s3 = inlined_call_operand.hbm [shape: f32[8,16], index: 3, kind: output, shape index: {}]  }
   0x1   :  { %v16_v0 = vld [vmem:[%s243_s1] sm:$0xff]  ;;  %v17_v1 = vld [vmem:[%s243_s1 + $0x8] sm:$0xff]  ;;  %v18_v2 = vld [vmem:[%s243_s1 + $0x10] sm:$0xff]  ;;  %147 = vmatprep.subr.bf16.mxu0 %v185_v3  ;;  %144 = vmatprep.mubr.msk.f32.mxu0 %vm186_vm0, %v187_v6 }
   0x2   :  { %v148_v4 = vpack.c.bf16 %v17_v1, %v16_v0  ;;  %v19_v5 = vld [vmem:[%s243_s1 + $0x18] sm:$0xff] }
   0x3   :  { %8 = vsyncpa [#allocation3], 0  ;;  %v151_v7 = vpack.c.bf16 %v19_v5, %v18_v2  ;;  %v15_v8 = vld [vmem:[%s242_s0] sm:$0xff]  ;;  %vm27_vm1 = vcmask 261120   ;;  %vm101_vm2 = vcmask 130048   ;;  %s188_s0 = smov [#allocation2]  }
   0x4   :  { %149 = vmatpush3.bf16.msra.mxu0 %v148_v4  ;;  %v129_v9 = vld [vmem:[%s244_s2] ss:$0 sm:$0xff]  ;;  %s121_s1 = sshll.u32 %s188_s0, 4  ;;  %s122_s1 = int_to_ptr.vmem [resolvable:$true] %s121_s1 }
   0x5   :  { %150 = vmatprep.subr.bf16.mxu0 %v185_v3  ;;  %s161_s2 = scalar_lea.vmem %s122_s1, 128  ;;  %p166_p1 = scmp.lt.s32.totalorder %s122_s1, %s122_s1 }
   0x6   :  { %p162_p0 = scmp.ne.s32.totalorder %s122_s1, %s161_s2  ;;  %p167_p2 = scmp.lt.s32.totalorder %s161_s2, %s161_s2 }
   0x8   :  { %152 = vmatpush3.bf16.msra.mxu0 %v151_v7  ;;  %p168_p3 = por %p167_p2, %p166_p1 }
   0xa   :  { %p169_p4 = pnand %p168_p3, %p162_p0 }
   0xb   :  { %145 = vmatmul.mubr.msk.f32.vlgmr.msra.gmra.mrb[0].mxu0 %vm27_vm1, %v15_v8 }
  0xde   :  { %v97_v10 = vpop.f32.mrb[0].mxu0 }
  0xdf   :  { %v98_v11 = vadd.f32 %v129_v9, %v97_v10  ;;  %v146_v12 = vpop.f32.mrb[1].mxu0 }
  0xe1   :  { %v102_v13 = vsel %vm101_vm2, %v98_v11, -inf }
  0xe2   :  { %103 = vmax.xlane.f32.xlu0 %v102_v13 }
 0x16f   :  { %v104_v14 = vpop.xlane.xlu0 %103 }
 0x170   :  { %v105_v15 = vsub.f32 %v98_v11, %v104_v14 }
 0x172   :  { %v106_v16 = vmul.f32 1.442695, %v105_v15 }
 0x174   :  { %157 = vpow2.f32 %v106_v16 }
 0x17e   :  { %v158_v17 = vpop.eup %157 }
 0x17f   :  { %v108_v18 = vsel %vm101_vm2, %v158_v17, 0.0 }
 0x180   :  { %109 = vadd.xlane.f32.xlu0 %v108_v18 }
 0x20d   :  { %v110_v19 = vpop.xlane.xlu0 %109 }
 0x20e   :  { %159 = vlog2.f32 %v110_v19 }
 0x218   :  { %v160_v20 = vpop.eup %159 }
 0x219   :  { %v112_v21 = vmul.f32 0.6931472, %v160_v20 }
 0x21b   :  { %v113_v22 = vsub.f32 %v105_v15, %v112_v21 }
 0x21d   :  { %114 = vst.msk [vmem:[#allocation2] sm:$0xff] %vm101_vm2, %v113_v22 }
 0x21e   :  { %172 = shalt.err (!%p169_p4)
}
 0x21f   :  { %s173_s26 = scalar_lea.hbm %s245_s3, 128 }
 0x220   :  { %p174_p5 = scmp.ne.s32.totalorder %s245_s3, %s173_s26  ;;  %p177_p6 = scmp.lt.u32.totalorder %s173_s26, %s245_s3 }
 0x222   :  { %p179_p7 = pnand %p177_p6, %p174_p5 }
 0x224   :  { %182 = shalt.err (!%p179_p7)
}
 0x225   :  { %124 = dma.vmem_to_hbm [thread:$0]  %s122_s1, 128, %s245_s3, [#allocation3]  }
 0x226   :  { %183 = dma.done.wait [#allocation3], 128  }
 0x227   :  { %184 = vsyncadd [#allocation3], 4294967168 }
 0x228   :  { %128 = vsyncpa [#allocation3], 1 }

</bundles_post_ra>
